<compile_context>
chip_gen: v6e
topology: v6e:2x2x1
jax: 0.10.0
libtpu: 0.0.40
codegen_flags: <defaults>
</compile_context>

<pallas_src>
from functools import partial

import jax
import jax.numpy as jnp
from jax.experimental import pallas as pl
from jax.experimental.pallas import tpu as pltpu


def _round_up(n, m):
    return (n + m - 1) // m * m


def _sublane_align(itemsize):
    # rows per packed sublane group: 8 for 4-byte, 16 for 2-byte, 32 for 1-byte
    return {4: 8, 2: 16, 1: 32}.get(itemsize, 8)


def _vmem_limit_bytes():
    """Per-generation scoped-VMEM limit: ~3/4 of physical capacity, <= 100 MiB.

    v5e/v6e (128 MiB physical) -> 96 MiB; v7x (64 MiB) -> 48 MiB.  Falls back
    to the most conservative (v7x) figure if the query is unavailable.
    """
    try:
        cap = int(pltpu.get_tpu_info().vmem_capacity_bytes)
    except Exception:
        cap = 64 << 20
    return int(min(cap * 3 // 4, 100 << 20))


def _choose_tb(b, row_bytes, align, x_block_budget, target_rows, lp):
    """Pick the per-step batch tile TB (multiple of `align`)."""
    tb = _round_up(max(1, target_rows // max(lp, 1)), align)      # MXU row target
    tb_vmem = max(align, (x_block_budget // max(row_bytes, 1)) // align * align)
    tb = min(tb, tb_vmem)
    b_al = _round_up(b, align)
    # Keep >= 2 grid steps per TensorCore (>= 4 total) when the batch allows,
    # else >= 2 total, so double-buffered DMA overlaps compute (v7x megacore).
    for steps in (4, 2):
        if b_al >= steps * align:
            tb = min(tb, max(align, (b_al // steps) // align * align))
            break
    return min(tb, b_al)


def _prep_params(w1, b1, w2, c_pad, x_dtype):
    H, C = w1.shape
    w1t = jnp.transpose(w1)                       # (C, H) -> (in, out)
    if c_pad != C:
        w1t = jnp.pad(w1t, ((0, c_pad - C), (0, 0)))
    # Keep the MXU on the activation dtype's native path (bf16 stays bf16).
    w1t = w1t.astype(x_dtype)
    return w1t, b1.reshape(1, H), w2.reshape(1, H)


# ----------------------------------------------------------------------------
# Kernel bodies
# ----------------------------------------------------------------------------

def _attn_pool_math(x_blc, w1t, b1, w2row, l_valid):
    """Attention-pooling math on a sequence-major (TB, Lp, C) block.

    Matmul/accumulation in f32; x_blc / w1t stay in their native dtype (no f32
    copy of the block, native bf16 MXU path).  Returns f32 (TB, C).
    """
    TB, Lp, C = x_blc.shape
    H = w1t.shape[1]

    # Linear1 + ReLU: one fused (TB*Lp, C) @ (C, H) MXU matmul, f32 accumulate.
    h = jnp.dot(x_blc.reshape(TB * Lp, C), w1t,
                preferred_element_type=jnp.float32)               # (TB*Lp, H)
    h = jnp.maximum(h + b1, 0.0)

    # Linear2 (output width 1): VPU multiply + lane reduction (MXU stays free).
    # Linear2's scalar bias is dropped: softmax over L is shift-invariant.
    s = jnp.sum((h * w2row).reshape(TB, Lp, H), axis=-1, keepdims=True)  # (TB, Lp, 1)

    # Mask padded sequence slots (static check -> no code when Lp == L).
    if l_valid != Lp:
        l_idx = jax.lax.broadcasted_iota(jnp.int32, (TB, Lp, 1), 1)
        s = jnp.where(l_idx < l_valid, s, -jnp.inf)

    # Softmax over the sequence axis, per batch element (EUP exp + approx vrcp).
    m = jnp.max(s, axis=1, keepdims=True)
    e = jnp.exp(s - m)
    a = e * pl.reciprocal(jnp.sum(e, axis=1, keepdims=True), approx=True)

    # Weighted sum over L; f32 `a` promotes the product (no explicit x upcast).
    return jnp.sum(a * x_blc, axis=1)                              # (TB, C) f32


def _attn_pool_blc_kernel(xt_ref, w1_ref, b1_ref, w2_ref, out_ref, *, l_valid):
    # xt_ref: (TB, Lp, C) sequence-major block.
    out = _attn_pool_math(xt_ref[...], w1_ref[...], b1_ref[...], w2_ref[...], l_valid)
    out_ref[...] = out.astype(out_ref.dtype)


def _attn_pool_ncl_kernel(x_ref, w1_ref, b1_ref, w2_ref, out_ref, *, l_valid):
    # x_ref: (TB, C, Lp) PyTorch NCL block.  Transpose in-kernel (XLU vxpose)
    # so there is no separate HBM transpose pass for the NCL entry point.
    x_blc = jnp.transpose(x_ref[...], (0, 2, 1))                   # (TB, Lp, C)
    out = _attn_pool_math(x_blc, w1_ref[...], b1_ref[...], w2_ref[...], l_valid)
    out_ref[...] = out.astype(out_ref.dtype)


# ----------------------------------------------------------------------------
# pallas_call plumbing
# ----------------------------------------------------------------------------

def _run_kernel(kernel, x_padded, block_x, w1t, b1r, w2r, tb, b_pad, c_pad, H,
                vmem_limit, x_buffers, l_valid):
    # Optional 3-deep input pipelining (sweep candidate on v6e for small blocks).
    x_spec_kw = dict(pipeline_mode=pl.Buffered(x_buffers)) if x_buffers > 2 else {}
    return pl.pallas_call(
        partial(kernel, l_valid=l_valid),
        out_shape=jax.ShapeDtypeStruct((b_pad, c_pad), x_padded.dtype),
        grid_spec=pltpu.PrefetchScalarGridSpec(
            num_scalar_prefetch=0,
            grid=(b_pad // tb,),
            in_specs=[
                pl.BlockSpec(block_x, lambda b: (b, 0, 0), **x_spec_kw),
                pl.BlockSpec((c_pad, H), lambda b: (0, 0)),
                pl.BlockSpec((1, H), lambda b: (0, 0)),
                pl.BlockSpec((1, H), lambda b: (0, 0)),
            ],
            out_specs=pl.BlockSpec((tb, c_pad), lambda b: (b, 0)),
        ),
        compiler_params=pltpu.CompilerParams(
            dimension_semantics=("parallel",),
            vmem_limit_bytes=vmem_limit),
    )(x_padded, w1t, b1r, w2r)


def attentive_pooling_blc(xt, w1, b1, w2, b2=None, *, target_rows=1024, x_buffers=2):
    """xt: (B, L, C) sequence-major (channels on the lane axis). Returns (B, C).

    b2 is accepted for API parity but unused (softmax is shift-invariant).
    """
    B, L, C = xt.shape
    H = w1.shape[0]
    if L == 0:
        return jnp.zeros((B, C), xt.dtype)
    itemsize = jnp.dtype(xt.dtype).itemsize
    align = _sublane_align(itemsize)

    c_pad = _round_up(C, 128)                     # lane-dense K dim + output store
    lp = _round_up(L, align)                      # clean sublane packing
    vmem_limit = _vmem_limit_bytes()
    x_block_budget = min(vmem_limit // 10, 8 << 20)
    row_bytes = lp * c_pad * itemsize             # VMEM bytes per batch element
    if align * row_bytes > vmem_limit // 6:
        # TODO(synk): add an L grid axis with online-softmax accumulation.
        raise NotImplementedError("sequence too long for single-block kernel")
    tb = _choose_tb(B, row_bytes, align, x_block_budget, target_rows, lp)
    b_pad = _round_up(B, tb)

    if (b_pad, lp, c_pad) != (B, L, C):
        xt = jnp.pad(xt, ((0, b_pad - B), (0, lp - L), (0, c_pad - C)))
    w1t, b1r, w2r = _prep_params(w1, b1, w2, c_pad, xt.dtype)

    out = _run_kernel(_attn_pool_blc_kernel, xt, (tb, lp, c_pad), w1t, b1r, w2r,
                      tb, b_pad, c_pad, H, vmem_limit, x_buffers, L)
    return out[:B, :C]


def attentive_pooling(x, w1, b1, w2, b2=None, *, target_rows=1024, x_buffers=2):
    """x: (B, C, L) PyTorch NCL layout. Returns (B, C)."""
    B, C, L = x.shape
    H = w1.shape[0]
    if L == 0:
        return jnp.zeros((B, C), x.dtype)
    itemsize = jnp.dtype(x.dtype).itemsize
    align = _sublane_align(itemsize)

    if L * itemsize < 256:
        # Tiny sequence axis: the NCL block would be lane-sparse in VMEM, so a
        # plain transpose + sequence-major kernel is the better layout here.
        # TODO(synk): producers that can emit (B, L, C) directly should call
        # attentive_pooling_blc and skip this extra HBM pass entirely.
        return attentive_pooling_blc(jnp.transpose(x, (0, 2, 1)), w1, b1, w2, b2,
                                     target_rows=target_rows, x_buffers=x_buffers)

    c_pad = _round_up(C, 128)
    lp = _round_up(L, 128)                        # lane-dense NCL block + clean vxpose
    vmem_limit = _vmem_limit_bytes()
    x_block_budget = min(vmem_limit // 10, 8 << 20)
    row_bytes = c_pad * lp * itemsize             # VMEM bytes per batch element
    if align * row_bytes > vmem_limit // 6:
        # TODO(synk): add an L grid axis with online-softmax accumulation.
        raise NotImplementedError("sequence too long for single-block kernel")
    tb = _choose_tb(B, row_bytes, align, x_block_budget, target_rows, lp)
    b_pad = _round_up(B, tb)

    if (b_pad, c_pad, lp) != (B, C, L):
        x = jnp.pad(x, ((0, b_pad - B), (0, c_pad - C), (0, lp - L)))
    w1t, b1r, w2r = _prep_params(w1, b1, w2, c_pad, x.dtype)

    out = _run_kernel(_attn_pool_ncl_kernel, x, (tb, c_pad, lp), w1t, b1r, w2r,
                      tb, b_pad, c_pad, H, vmem_limit, x_buffers, L)
    return out[:B, :C]


# ----------------------------------------------------------------------------
# Reference + test
# ----------------------------------------------------------------------------

def attentive_pooling_ref(x, w1, b1, w2, b2):
    """Plain-JAX (f32) reference mirroring the PyTorch forward exactly."""
    x, w1, b1, w2, b2 = (a.astype(jnp.float32) for a in (x, w1, b1, w2, b2))
    xt = jnp.transpose(x, (0, 2, 1))                          # (B, L, C)
    h = jnp.maximum(xt @ w1.T + b1, 0.0)                      # (B, L, H)
    s = h @ w2.T + b2                                         # (B, L, 1)
    a = jax.nn.softmax(jnp.transpose(s, (0, 2, 1)), axis=-1)  # (B, 1, L)
    return jnp.sum(x * a, axis=-1)                            # (B, C)


if __name__ == "__main__":
    H = 32  # hidden_size from the module

    def make_case(key, B, C, L, dtype):
        kx, kw1, kb1, kw2, kb2 = jax.random.split(key, 5)
        x = jax.random.normal(kx, (B, C, L), dtype=jnp.float32).astype(dtype)
        bound1 = 1.0 / jnp.sqrt(C)
        w1 = jax.random.uniform(kw1, (H, C), minval=-bound1, maxval=bound1).astype(dtype)
        b1 = jax.random.uniform(kb1, (H,), minval=-bound1, maxval=bound1).astype(dtype)
        bound2 = 1.0 / jnp.sqrt(H)
        w2 = jax.random.uniform(kw2, (1, H), minval=-bound2, maxval=bound2).astype(dtype)
        b2 = jax.random.uniform(kb2, (1,), minval=-bound2, maxval=bound2).astype(dtype)
        return x, w1, b1, w2, b2

    key = jax.random.PRNGKey(0)
    k1, k2, k3 = jax.random.split(key, 3)

    cases = [
        ("f32 short-L  (BLC kernel)",        make_case(k1, 16, 128, 8,   jnp.float32),  1e-2),
        ("bf16 long-L  (fused NCL kernel)",  make_case(k2, 8,  128, 256, jnp.bfloat16), 5e-2),
        ("f32 ragged-L (mask + pad path)",   make_case(k3, 4,  128, 13,  jnp.float32),  1e-2),
    ]

    for name, (x, w1, b1, w2, b2), tol in cases:
        out = jax.block_until_ready(attentive_pooling(x, w1, b1, w2, b2))
        ref = attentive_pooling_ref(x, w1, b1, w2, b2)
        assert out.shape == (x.shape[0], x.shape[1]), (name, out.shape)
        out_f32 = out.astype(jnp.float32)
        assert bool(jnp.all(jnp.isfinite(out_f32))), name
        err = float(jnp.max(jnp.abs(out_f32 - ref)))
        assert err <= tol, (name, err)

    print("KERNEL_OK")
</pallas_src>

<mosaic_0001>
module attributes {stable_mosaic.version = 11 : i64} {
  func.func @_attn_pool_blc_kernel(%arg0: i32, %arg1: memref<8x8x128xf32, #tpu.memory_space<vmem>>, %arg2: memref<128x32xf32, #tpu.memory_space<vmem>>, %arg3: memref<1x32xf32, #tpu.memory_space<vmem>>, %arg4: memref<1x32xf32, #tpu.memory_space<vmem>>, %arg5: memref<8x128xf32, #tpu.memory_space<vmem>>) attributes {dimension_semantics = [#tpu.dimension_semantics<parallel>], iteration_bounds = array<i64: 2>, scalar_prefetch = 0 : i64, scratch_operands = 0 : i64, tpu.core_type = #tpu.core_type<tc>, window_params = [{transform_indices = @transform_0, window_bounds = array<i64: 8, 8, 128>}, {pipeline_mode = #tpu.pipeline_mode<synchronous>, transform_indices = @transform_1, window_bounds = array<i64: 128, 32>}, {pipeline_mode = #tpu.pipeline_mode<synchronous>, transform_indices = @transform_2, window_bounds = array<i64: 1, 32>}, {pipeline_mode = #tpu.pipeline_mode<synchronous>, transform_indices = @transform_3, window_bounds = array<i64: 1, 32>}, {transform_indices = @transform_4, window_bounds = array<i64: 8, 128>}]} {
    %c0 = arith.constant 0 : index
    %c0_0 = arith.constant 0 : index
    %c0_1 = arith.constant 0 : index
    %0 = vector.load %arg1[%c0, %c0_0, %c0_1] : memref<8x8x128xf32, #tpu.memory_space<vmem>>, vector<8x8x128xf32>
    %c0_2 = arith.constant 0 : index
    %c0_3 = arith.constant 0 : index
    %1 = vector.load %arg2[%c0_2, %c0_3] : memref<128x32xf32, #tpu.memory_space<vmem>>, vector<128x32xf32>
    %c0_4 = arith.constant 0 : index
    %c0_5 = arith.constant 0 : index
    %2 = vector.load %arg3[%c0_4, %c0_5] : memref<1x32xf32, #tpu.memory_space<vmem>>, vector<1x32xf32>
    %c0_6 = arith.constant 0 : index
    %c0_7 = arith.constant 0 : index
    %3 = vector.load %arg4[%c0_6, %c0_7] : memref<1x32xf32, #tpu.memory_space<vmem>>, vector<1x32xf32>
    %4 = vector.shape_cast %0 : vector<8x8x128xf32> to vector<64x128xf32>
    %cst = arith.constant dense<0.000000e+00> : vector<64x32xf32>
    %5 = tpu.matmul %4, %1, %cst {dimension_numbers = #tpu.dot_dimension_numbers<[1], [0], [0], [1], [0, 0, 1, 1], [], []>} : vector<64x128xf32>, vector<128x32xf32>, vector<64x32xf32> -> vector<64x32xf32>
    %6 = vector.broadcast %2 : vector<1x32xf32> to vector<64x32xf32>
    %7 = arith.addf %5, %6 : vector<64x32xf32>
    %cst_8 = arith.constant 0.000000e+00 : f32
    %8 = vector.broadcast %cst_8 : f32 to vector<64x32xf32>
    %9 = arith.maximumf %7, %8 : vector<64x32xf32>
    %10 = vector.broadcast %3 : vector<1x32xf32> to vector<64x32xf32>
    %11 = arith.mulf %9, %10 : vector<64x32xf32>
    %12 = vector.shape_cast %11 : vector<64x32xf32> to vector<8x8x32xf32>
    %cst_9 = arith.constant dense<0.000000e+00> : vector<8x8xf32>
    %13 = vector.multi_reduction <add>, %12, %cst_9 [2] : vector<8x8x32xf32> to vector<8x8xf32>
    %14 = vector.shape_cast %13 : vector<8x8xf32> to vector<8x8x1xf32>
    %cst_10 = arith.constant dense<0xFF800000> : vector<8x1xf32>
    %15 = vector.multi_reduction <maximumf>, %14, %cst_10 [1] : vector<8x8x1xf32> to vector<8x1xf32>
    %16 = vector.shape_cast %15 : vector<8x1xf32> to vector<8x1x1xf32>
    %17 = vector.broadcast %16 : vector<8x1x1xf32> to vector<8x8x1xf32>
    %18 = arith.subf %14, %17 : vector<8x8x1xf32>
    %19 = math.exp %18 : vector<8x8x1xf32>
    %cst_11 = arith.constant dense<0.000000e+00> : vector<8x1xf32>
    %20 = vector.multi_reduction <add>, %19, %cst_11 [1] : vector<8x8x1xf32> to vector<8x1xf32>
    %21 = vector.shape_cast %20 : vector<8x1xf32> to vector<8x1x1xf32>
    %22 = tpu.reciprocal %21 {approx = true} : vector<8x1x1xf32> -> vector<8x1x1xf32>
    %23 = vector.broadcast %22 : vector<8x1x1xf32> to vector<8x8x1xf32>
    %24 = arith.mulf %19, %23 : vector<8x8x1xf32>
    %25 = vector.broadcast %24 : vector<8x8x1xf32> to vector<8x8x128xf32>
    %26 = arith.mulf %25, %0 : vector<8x8x128xf32>
    %cst_12 = arith.constant dense<0.000000e+00> : vector<8x128xf32>
    %27 = vector.multi_reduction <add>, %26, %cst_12 [1] : vector<8x8x128xf32> to vector<8x128xf32>
    %c0_13 = arith.constant 0 : index
    %c0_14 = arith.constant 0 : index
    %28 = vector.load %arg5[%c0_13, %c0_14] : memref<8x128xf32, #tpu.memory_space<vmem>>, vector<8x128xf32>
    tpu.vector_store %arg5[%c0_13, %c0_14], %27 {strides = array<i32>} : memref<8x128xf32, #tpu.memory_space<vmem>>, vector<8x128xf32>,
    return
  }
  func.func @transform_0(%arg0: i32) -> (i32, i32, i32) {
    %c0_i32 = arith.constant 0 : i32
    %c0_i32_0 = arith.constant 0 : i32
    %c0_i32_1 = arith.constant 0 : i32
    return %arg0, %c0_i32, %c0_i32_0 : i32, i32, i32
  }
  func.func @transform_1(%arg0: i32) -> (i32, i32) {
    %c0_i32 = arith.constant 0 : i32
    %c0_i32_0 = arith.constant 0 : i32
    %c0_i32_1 = arith.constant 0 : i32
    return %c0_i32, %c0_i32_0 : i32, i32
  }
  func.func @transform_2(%arg0: i32) -> (i32, i32) {
    %c0_i32 = arith.constant 0 : i32
    %c0_i32_0 = arith.constant 0 : i32
    %c0_i32_1 = arith.constant 0 : i32
    return %c0_i32, %c0_i32_0 : i32, i32
  }
  func.func @transform_3(%arg0: i32) -> (i32, i32) {
    %c0_i32 = arith.constant 0 : i32
    %c0_i32_0 = arith.constant 0 : i32
    %c0_i32_1 = arith.constant 0 : i32
    return %c0_i32, %c0_i32_0 : i32, i32
  }
  func.func @transform_4(%arg0: i32) -> (i32, i32) {
    %c0_i32 = arith.constant 0 : i32
    %c0_i32_0 = arith.constant 0 : i32
    return %arg0, %c0_i32 : i32, i32
  }
}

</mosaic_0001>

<bundles_post_ra>
// kernel: tpu_custom_call.1
= control target key start
LH: loop header
LB: loop body
LE: loop exit
PB: predicated region body
PF: predicated region fallthrough
CT: control target
= control target key end

     0   :  { %9 = vsyncpa [#allocation3], 0  ;;  %s1186_s0 = inlined_call_operand.vmem [shape: f32[16,8,128], index: 0, kind: input, shape index: {}]   ;;  %s1187_s1 = inlined_call_operand.vmem [shape: f32[128,32], index: 1, kind: input, shape index: {}]   ;;  %s1188_s2 = inlined_call_operand.vmem [shape: f32[1,32], index: 2, kind: input, shape index: {}]   ;;  %s1189_s3 = inlined_call_operand.vmem [shape: f32[1,32], index: 3, kind: input, shape index: {}]   ;;  %s1190_s4 = inlined_call_operand.hbm [shape: f32[16,128], index: 4, kind: output, shape index: {}]  }
   0x1   :  { %11 = vsyncpa [#allocation3 + $0x1], 0  ;;  %s943_s15 = smov 0   ;;  %s945_s16 = smov 0  }
   0x2   :  { %s947_s17 = smov 0   ;;  %s949_s18 = smov 0  }
   0x3 LB: > { %s964_s19 = sadd.s32 4294967295, %s915_s18   ;;  %s671_s20 = sadd.s32 4294967294, %s915_s18   ;;  %s915_s18 = sphi %s949_s18, %s1196_s18   ;;  %s911_s17 = sphi %s947_s17, %s1195_s17   ;;  %s907_s16 = sphi %s945_s16, %s1194_s16   ;;  %s903_s15 = sphi %s943_s15, %s1193_s15  }
   0x4   : > { %s968_s21 = sadd.s32 1, %s915_s18   ;;  %s113_s22 = sadd.s32 1, %s911_s17 }
   0x5   : > { %s110_s23 = ssub.s32 %s915_s18, %s968_s21  ;;  %p123_p0 = scmp.ne.s32.totalorder %s911_s17, %s907_s16 }
   0x6   : > { %p111_p1 = scmp.eq.s32.totalorder %s110_s23, 0  ;;  %p124_p2 = scmp.eq.s32.totalorder %s964_s19, 1 }
   0x7   : > { %p129_p3 = scmp.ne.s32.totalorder %s907_s16, %s903_s15  ;;  %p130_p4 = scmp.eq.s32.totalorder %s671_s20, 1 }
   0x8   : > { %s979_s24 = scalar_select %p111_p1, %s911_s17, %s113_s22  }
   0x9   : > { %p981_p5 = por %p124_p2, %p123_p0  ;;  %p985_p6 = por %p130_p4, %p129_p3 }
   0xa   : > { %p674_p7 = scmp.ge.s32.totalorder %s915_s18, 1  ;;  %p166_p8 = scmp.lt.s32.totalorder %s915_s18, 3 }
   0xc   : > { %p167_p9 = pnand %p674_p7, %p166_p8 }
   0xd   : > { %s676_s11 = sshll.u32 (!%p167_p9), %s964_s19, 3  ;;  %s189_s8 = sand.u32 (!%p167_p9), 1, %s907_s16  }
   0xe   : > { %170 = sbr.rel (%p167_p9) target bundleno = 492 (0x1ec), region = 36  ;;  %p193_p10 = scmp.lt.s32.totalorder (!%p167_p9), %s676_s11, 15 }
   0xf   : > { %s1142_s9 = sshll.u32 (!%p167_p9), %s189_s8, 3  ;;  %s681_s10 = sshll.u32 (!%p167_p9), %s964_s19, 7 }
  0x10   : > { %s191_s12 = scalar_lea.vmem (!%p167_p9), [#allocation2], %s1142_s9  ;;  %s599_s22 = scalar_lea.sflag (!%p167_p9), [#allocation3], %s189_s8 }
  0x11   : > { %s917_s19 = smov (!%p167_p9), [#allocation2]  }
  0x12   : > { %s859_s27 = sshll.u32 (!%p167_p9), %s917_s19, 4  ;;  %s860_s27 = int_to_ptr.vmem [resolvable:$false] %s859_s27 }
  0x13   : > { %v221_v0 = vld [vmem:[%s1187_s1 + $0x78] sm:$0xff]  ;;  %v220_v1 = vld [vmem:[%s1187_s1 + $0x70] sm:$0xff]  ;;  %v219_v2 = vld [vmem:[%s1187_s1 + $0x68] sm:$0xff]  ;;  %s1198_s11 = smov (!%p193_p10, %s676_s11), 15  ;;  %vm357_vm0 = vcmask 261120   ;;  %vm582_vm1 = vcmask 1041409  }
  0x14   : > { %708 = vmatprep.subr.mxu0 %v221_v0  ;;  %752 = vmatprep.subr.mxu1 %v221_v0  ;;  %v218_v3 = vld [vmem:[%s1187_s1 + $0x60] sm:$0xff]  ;;  %v217_v4 = vld [vmem:[%s1187_s1 + $0x58] sm:$0xff]  ;;  %v216_v5 = vld [vmem:[%s1187_s1 + $0x50] sm:$0xff]  ;;  %s677_s7 = sshll.u32 %s1198_s11, 3  ;;  %vm584_vm2 = vcmask 1042434   ;;  %vm586_vm3 = vcmask 1043459   ;;  %s1149_s11 = scalar_lea.hbm %s1190_s4, %s681_s10 }
  0x15   : > { %709 = vmatpush3.msra.mxu0 %v221_v0  ;;  %768 = vmatpush3.msra.mxu1 %v221_v0  ;;  %v215_v6 = vld [vmem:[%s1187_s1 + $0x48] sm:$0xff]  ;;  %v214_v7 = vld [vmem:[%s1187_s1 + $0x40] sm:$0xff]  ;;  %v213_v8 = vld [vmem:[%s1187_s1 + $0x38] sm:$0xff]  ;;  %s1031_s13 = scalar_lea.vmem %s1186_s0, %s677_s7  ;;  %vm588_vm4 = vcmask 1044484   ;;  %vm590_vm5 = vcmask 1045509   ;;  %vm592_vm6 = vcmask 1046534  }
  0x16   : > { %710 = vmatprep.subr.mxu0 %v220_v1  ;;  %753 = vmatprep.subr.mxu1 %v220_v1  ;;  %v212_v9 = vld [vmem:[%s1187_s1 + $0x30] sm:$0xff]  ;;  %v211_v10 = vld [vmem:[%s1187_s1 + $0x28] sm:$0xff]  ;;  %v210_v11 = vld [vmem:[%s1187_s1 + $0x20] sm:$0xff]  ;;  %vm594_vm7 = vcmask 1047559   ;;  %s861_s28 = scalar_lea.vmem %s860_s27, 256 }
  0x17   : > { %711 = vmatpush3.msra.mxu0 %v220_v1  ;;  %769 = vmatpush3.msra.mxu1 %v220_v1  ;;  %v209_v12 = vld [vmem:[%s1187_s1 + $0x18] sm:$0xff]  ;;  %v208_v13 = vld [vmem:[%s1187_s1 + $0x10] sm:$0xff]  ;;  %v1040_v14 = vld [vmem:[%s1031_s13] sm:$0xff] }
  0x18   : > { %712 = vmatprep.subr.mxu0 %v219_v2  ;;  %754 = vmatprep.subr.mxu1 %v219_v2  ;;  %v207_v15 = vld [vmem:[%s1187_s1 + $0x8] sm:$0xff]  ;;  %v206_v16 = vld [vmem:[%s1187_s1] sm:$0xff]  ;;  %v1053_v18 = vld [vmem:[%s1031_s13 + $0x10] sm:$0xff] }
  0x19   : > { %713 = vmatpush3.msra.mxu0 %v219_v2  ;;  %770 = vmatpush3.msra.mxu1 %v219_v2  ;;  %v1050_v17 = vld [vmem:[%s1031_s13 + $0x8] sm:$0xff]  ;;  %v1056_v19 = vld [vmem:[%s1031_s13 + $0x20] sm:$0xff]  ;;  %v1063_v21 = vld [vmem:[%s1031_s13 + $0x30] sm:$0xff] }
  0x1a   : > { %714 = vmatprep.subr.mxu0 %v218_v3  ;;  %755 = vmatprep.subr.mxu1 %v218_v3  ;;  %v1059_v20 = vld [vmem:[%s1031_s13 + $0x28] sm:$0xff]  ;;  %v1067_v22 = vld [vmem:[%s1031_s13 + $0x18] sm:$0xff]  ;;  %v678_v24 = vld [vmem:[%s1188_s2] ss:$0 sm:$0xff] }
  0x1b   : > { %715 = vmatpush3.msra.mxu0 %v218_v3  ;;  %771 = vmatpush3.msra.mxu1 %v218_v3  ;;  %v1073_v23 = vld [vmem:[%s1031_s13 + $0x38] sm:$0xff]  ;;  %v679_v31 = vld [vmem:[%s1189_s3] ss:$0 sm:$0xff]  ;;  %s612_s13 = sshll.u32 %s191_s12, 4  ;;  %s613_s13 = int_to_ptr.vmem [resolvable:$true] %s612_s13 }
  0x1c   : > { %716 = vmatprep.subr.mxu0 %v217_v4  ;;  %756 = vmatprep.subr.mxu1 %v217_v4  ;;  %s855_s23 = scalar_lea.vmem %s613_s13, 128  ;;  %p862_p0 = scmp.lt.s32.totalorder %s613_s13, %s860_s27 }
  0x1d   : > { %717 = vmatpush3.msra.mxu0 %v217_v4  ;;  %772 = vmatpush3.msra.mxu1 %v217_v4  ;;  %p856_p11 = scmp.ne.s32.totalorder %s613_s13, %s855_s23  ;;  %p863_p1 = scmp.lt.s32.totalorder %s861_s28, %s855_s23 }
  0x1e   : > { %718 = vmatprep.subr.mxu0 %v216_v5  ;;  %757 = vmatprep.subr.mxu1 %v216_v5 }
  0x1f   : > { %719 = vmatpush3.msra.mxu0 %v216_v5  ;;  %773 = vmatpush3.msra.mxu1 %v216_v5  ;;  %p857_p12 = pnand %p856_p11, %p981_p5  ;;  %p864_p2 = por %p863_p1, %p862_p0 }
  0x20   : > { %720 = vmatprep.subr.mxu0 %v215_v6  ;;  %758 = vmatprep.subr.mxu1 %v215_v6 }
  0x21   : > { %721 = vmatpush3.msra.mxu0 %v215_v6  ;;  %774 = vmatpush3.msra.mxu1 %v215_v6  ;;  %p858_p13 = pneg %p857_p12 }
  0x22   : > { %722 = vmatprep.subr.mxu0 %v214_v7  ;;  %759 = vmatprep.subr.mxu1 %v214_v7 }
  0x23   : > { %723 = vmatpush3.msra.mxu0 %v214_v7  ;;  %775 = vmatpush3.msra.mxu1 %v214_v7  ;;  %p865_p3 = pnand %p864_p2, %p858_p13 }
  0x24   : > { %724 = vmatprep.subr.mxu0 %v213_v8  ;;  %760 = vmatprep.subr.mxu1 %v213_v8 }
  0x25   : > { %725 = vmatpush3.msra.mxu0 %v213_v8  ;;  %776 = vmatpush3.msra.mxu1 %v213_v8 }
  0x26   : > { %726 = vmatprep.subr.mxu0 %v212_v9  ;;  %761 = vmatprep.subr.mxu1 %v212_v9 }
  0x27   : > { %727 = vmatpush3.msra.mxu0 %v212_v9  ;;  %777 = vmatpush3.msra.mxu1 %v212_v9 }
  0x28   : > { %728 = vmatprep.subr.mxu0 %v211_v10  ;;  %762 = vmatprep.subr.mxu1 %v211_v10 }
  0x29   : > { %729 = vmatpush3.msra.mxu0 %v211_v10  ;;  %778 = vmatpush3.msra.mxu1 %v211_v10 }
  0x2a   : > { %730 = vmatprep.subr.mxu0 %v210_v11  ;;  %763 = vmatprep.subr.mxu1 %v210_v11 }
  0x2b   : > { %731 = vmatpush3.msra.mxu0 %v210_v11  ;;  %779 = vmatpush3.msra.mxu1 %v210_v11 }
  0x2c   : > { %732 = vmatprep.subr.mxu0 %v209_v12  ;;  %764 = vmatprep.subr.mxu1 %v209_v12 }
  0x2d   : > { %733 = vmatpush3.msra.mxu0 %v209_v12  ;;  %780 = vmatpush3.msra.mxu1 %v209_v12 }
  0x2e   : > { %734 = vmatprep.subr.mxu0 %v208_v13  ;;  %740 = vmatprep.mubr.f32.mxu0 %v1040_v14 }
  0x2f   : > { %735 = vmatpush3.msra.mxu0 %v208_v13  ;;  %765 = vmatprep.subr.mxu1 %v208_v13 }
  0x30   : > { %736 = vmatprep.subr.mxu0 %v207_v15  ;;  %781 = vmatpush3.msra.mxu1 %v208_v13 }
  0x31   : > { %737 = vmatpush3.msra.mxu0 %v207_v15  ;;  %766 = vmatprep.subr.mxu1 %v207_v15 }
  0x32   : > { %738 = vmatprep.subr.mxu0 %v206_v16  ;;  %782 = vmatpush3.msra.mxu1 %v207_v15 }
  0x33   : > { %739 = vmatpush3.msra.mxu0 %v206_v16  ;;  %767 = vmatprep.subr.mxu1 %v206_v16 }
  0x34   : > { %741 = vmatmul.mubr.f32.vlgmr.msra.gmra.mxu0 %v1050_v17  ;;  %783 = vmatpush3.msra.mxu1 %v206_v16 }
  0x35   : > { %743 = vmatprep.mubr.f32.mxu0 %v1053_v18  ;;  %746 = vmatprep.mubr.f32.mxu1 %v1056_v19 }
  0x36   : > { %747 = vmatmul.mubr.f32.vlgmr.msra.gmra.mxu1 %v1059_v20 }
  0x37   : > { %749 = vmatprep.mubr.f32.mxu1 %v1063_v21 }
  0x38   : > { %744 = vmatmul.mubr.f32.gmra.mxu0 %v1067_v22 }
  0x3a   : > { %750 = vmatmul.mubr.f32.gmra.mxu1 %v1073_v23 }
  0xf4   : > { %v742_v25 = vpop.f32.mrf.mxu0 }
  0xf5   : > { %v302_v26 = vadd.f32 %v742_v25, %v678_v24 }
  0xf6   : > { %v296_v27 = vpop.f32.mrf.mxu0  ;;  %v748_v28 = vpop.f32.mrf.mxu1 }
  0xf7   : > { %v336_v29 = vmax.f32 %v302_v26, 0.0  ;;  %v297_v30 = vadd.f32 %v678_v24, %v296_v27  ;;  %v322_v38 = vadd.f32 %v748_v28, %v678_v24 }
  0xf8   : > { %v745_v32 = vpop.f32.mrf.mxu0  ;;  %v316_v33 = vpop.f32.mrf.mxu1 }
  0xf9   : > { %v335_v34 = vmax.f32 %v297_v30, 0.0  ;;  %v312_v35 = vadd.f32 %v745_v32, %v678_v24  ;;  %v317_v36 = vadd.f32 %v678_v24, %v316_v33  ;;  %v350_v39 = vmul.f32 %v679_v31, %v336_v29 }
  0xfa   : > { %v306_v37 = vpop.f32.mrf.mxu0  ;;  %v751_v40 = vpop.f32.mrf.mxu1  ;;  %v340_v50 = vmax.f32 %v322_v38, 0.0 }
  0xfb   : > { %v338_v41 = vmax.f32 %v312_v35, 0.0  ;;  %v307_v42 = vadd.f32 %v678_v24, %v306_v37  ;;  %v339_v43 = vmax.f32 %v317_v36, 0.0  ;;  %v361_v44 = vsel %vm357_vm0, %v350_v39, 0.0 }
  0xfc   : > { %v326_v45 = vpop.f32.mrf.mxu1  ;;  %v349_v46 = vmul.f32 %v679_v31, %v335_v34  ;;  %362 = vadd.xlane.f32.xlu0 %v361_v44  ;;  %v332_v52 = vadd.f32 %v751_v40, %v678_v24  ;;  %v354_v61 = vmul.f32 %v679_v31, %v340_v50 }
  0xfd   : > { %v337_v47 = vmax.f32 %v307_v42, 0.0  ;;  %v327_v48 = vadd.f32 %v678_v24, %v326_v45  ;;  %v352_v49 = vmul.f32 %v679_v31, %v338_v41  ;;  %v353_v51 = vmul.f32 %v679_v31, %v339_v43 }
  0xfe   : > { %v358_v56 = vsel %vm357_vm0, %v349_v46, 0.0  ;;  %v342_v59 = vmax.f32 %v332_v52, 0.0  ;;  %v373_v63 = vsel %vm357_vm0, %v354_v61, 0.0 }
  0xff   : > { %v341_v53 = vmax.f32 %v327_v48, 0.0  ;;  %v367_v54 = vsel %vm357_vm0, %v352_v49, 0.0  ;;  %v351_v55 = vmul.f32 %v679_v31, %v337_v47  ;;  %v370_v57 = vsel %vm357_vm0, %v353_v51, 0.0 }
 0x100   : > { %368 = vadd.xlane.f32.xlu1 %v367_v54  ;;  %359 = vadd.xlane.f32.xlu0 %v358_v56  ;;  %v356_v0 = vmul.f32 %v679_v31, %v342_v59 }
 0x101   : > { %v355_v58 = vmul.f32 %v679_v31, %v341_v53  ;;  %v364_v60 = vsel %vm357_vm0, %v351_v55, 0.0 }
 0x102   : > { %v379_v1 = vsel %vm357_vm0, %v356_v0, 0.0 }
 0x103   : > { %v376_v62 = vsel %vm357_vm0, %v355_v58, 0.0 }
 0x104   : > { %365 = vadd.xlane.f32.xlu1 %v364_v60  ;;  %371 = vadd.xlane.f32.xlu0 %v370_v57 }
 0x108   : > { %374 = vadd.xlane.f32.xlu1 %v373_v63  ;;  %377 = vadd.xlane.f32.xlu0 %v376_v62 }
 0x10c   : > { %380 = vadd.xlane.f32.xlu1 %v379_v1 }
 0x185   : > { %v363_v2 = vpop.xlane.xlu0 %362 }
 0x186   : > { %v388_v3 = vrot.slane %v363_v2, 4 }
 0x188   : > { %v389_v4 = vmax.f32 %v363_v2, %v388_v3 }
 0x189   : > { %v369_v5 = vpop.xlane.xlu1 %368  ;;  %v360_v7 = vpop.xlane.xlu0 %359 }
 0x18a   : > { %v400_v6 = vrot.slane %v369_v5, 4  ;;  %v390_v8 = vrot.slane %v389_v4, 2  ;;  %v382_v9 = vrot.slane %v360_v7, 4 }
 0x18c   : > { %v401_v10 = vmax.f32 %v369_v5, %v400_v6  ;;  %v391_v11 = vmax.f32 %v389_v4, %v390_v8  ;;  %v383_v12 = vmax.f32 %v360_v7, %v382_v9 }
 0x18d   : > { %v366_v13 = vpop.xlane.xlu1 %365  ;;  %v372_v24 = vpop.xlane.xlu0 %371 }
 0x18e   : > { %v402_v15 = vrot.slane %v401_v10, 2  ;;  %v394_v16 = vrot.slane %v366_v13, 4  ;;  %v392_v25 = vrot.slane %v391_v11, 1  ;;  %v384_v26 = vrot.slane %v383_v12, 2 }
 0x18f   : > { %v406_v27 = vrot.slane %v372_v24, 4 }
 0x190   : > { %v403_v28 = vmax.f32 %v401_v10, %v402_v15  ;;  %v395_v29 = vmax.f32 %v366_v13, %v394_v16  ;;  %v393_v30 = vmax.f32 %v391_v11, %v392_v25  ;;  %v385_v31 = vmax.f32 %v383_v12, %v384_v26 }
 0x191   : > { %v407_v32 = vmax.f32 %v372_v24, %v406_v27  ;;  %v375_v33 = vpop.xlane.xlu1 %374  ;;  %v378_v37 = vpop.xlane.xlu0 %377 }
 0x192   : > { %v404_v34 = vrot.slane %v403_v28, 1  ;;  %v396_v35 = vrot.slane %v395_v29, 2  ;;  %v412_v36 = vrot.slane %v375_v33, 4  ;;  %v431_v38 = vsub.f32 %v363_v2, %v393_v30 }
 0x193   : > { %v386_v39 = vrot.slane %v385_v31, 1  ;;  %v408_v40 = vrot.slane %v407_v32, 2  ;;  %v418_v41 = vrot.slane %v378_v37, 4 }
 0x194   : > { %v405_v42 = vmax.f32 %v403_v28, %v404_v34  ;;  %v397_v43 = vmax.f32 %v395_v29, %v396_v35  ;;  %v413_v44 = vmax.f32 %v375_v33, %v412_v36  ;;  %v440_v45 = vmul.f32 1.442695, %v431_v38 }
 0x195   : > { %v387_v46 = vmax.f32 %v385_v31, %v386_v39  ;;  %v409_v47 = vmax.f32 %v407_v32, %v408_v40  ;;  %v419_v48 = vmax.f32 %v378_v37, %v418_v41  ;;  %v381_v49 = vpop.xlane.xlu1 %380 }
 0x196   : > { %v433_v50 = vsub.f32 %v369_v5, %v405_v42  ;;  %v398_v51 = vrot.slane %v397_v43, 1  ;;  %v414_v52 = vrot.slane %v413_v44, 2  ;;  %v424_v53 = vrot.slane %v381_v49, 4 }
 0x197   : > { %823 = vpow2.f32 %v440_v45  ;;  %v430_v54 = vsub.f32 %v360_v7, %v387_v46  ;;  %v410_v55 = vrot.slane %v409_v47, 1  ;;  %v420_v56 = vrot.slane %v419_v48, 2 }
 0x198   : > { %v444_v57 = vmul.f32 1.442695, %v433_v50  ;;  %v399_v58 = vmax.f32 %v397_v43, %v398_v51  ;;  %v415_v59 = vmax.f32 %v413_v44, %v414_v52  ;;  %v425_v60 = vmax.f32 %v381_v49, %v424_v53 }
 0x199   : > { %v438_v61 = vmul.f32 1.442695, %v430_v54  ;;  %v411_v62 = vmax.f32 %v409_v47, %v410_v55  ;;  %v421_v63 = vmax.f32 %v419_v48, %v420_v56 }
 0x19a   : > { %825 = vpow2.f32 %v444_v57  ;;  %v432_v0 = vsub.f32 %v366_v13, %v399_v58  ;;  %v416_v1 = vrot.slane %v415_v59, 1  ;;  %v426_v2 = vrot.slane %v425_v60, 2 }
 0x19b   : > { %827 = vpow2.f32 %v438_v61  ;;  %v434_v3 = vsub.f32 %v372_v24, %v411_v62  ;;  %v422_v4 = vrot.slane %v421_v63, 1 }
 0x19c   : > { %v442_v5 = vmul.f32 1.442695, %v432_v0  ;;  %v417_v6 = vmax.f32 %v415_v59, %v416_v1  ;;  %v427_v8 = vmax.f32 %v425_v60, %v426_v2 }
 0x19d   : > { %v446_v7 = vmul.f32 1.442695, %v434_v3  ;;  %v423_v9 = vmax.f32 %v421_v63, %v422_v4 }
 0x19e   : > { %829 = vpow2.f32 %v442_v5  ;;  %v435_v10 = vsub.f32 %v375_v33, %v417_v6  ;;  %v428_v11 = vrot.slane %v427_v8, 1 }
 0x19f   : > { %831 = vpow2.f32 %v446_v7  ;;  %v436_v12 = vsub.f32 %v378_v37, %v423_v9 }
 0x1a0   : > { %v448_v15 = vmul.f32 1.442695, %v435_v10  ;;  %v429_v16 = vmax.f32 %v427_v8, %v428_v11 }
 0x1a1   : > { %v450_v25 = vmul.f32 1.442695, %v436_v12 }
 0x1a2   : > { %833 = vpow2.f32 %v448_v15  ;;  %v437_v13 = vsub.f32 %v381_v49, %v429_v16 }
 0x1a3   : > { %835 = vpow2.f32 %v450_v25 }
 0x1a4   : > { %v1091_v26 = vpop.eup %823  ;;  %v452_v24 = vmul.f32 1.442695, %v437_v13 }
 0x1a5   : > { %v460_v27 = vrot.slane %v1091_v26, 4 }
 0x1a6   : > { %837 = vpow2.f32 %v452_v24 }
 0x1a7   : > { %v1094_v28 = vpop.eup %825  ;;  %v461_v29 = vadd.f32 %v1091_v26, %v460_v27 }
 0x1a8   : > { %v1097_v30 = vpop.eup %827  ;;  %v472_v31 = vrot.slane %v1094_v28, 4 }
 0x1a9   : > { %v462_v32 = vrot.slane %v461_v29, 2  ;;  %v454_v33 = vrot.slane %v1097_v30, 4 }
 0x1aa   : > { %v473_v34 = vadd.f32 %v1094_v28, %v472_v31 }
 0x1ab   : > { %v1102_v35 = vpop.eup %829  ;;  %v463_v36 = vadd.f32 %v462_v32, %v461_v29  ;;  %v455_v37 = vadd.f32 %v1097_v30, %v454_v33 }
 0x1ac   : > { %v1105_v38 = vpop.eup %831  ;;  %v474_v39 = vrot.slane %v473_v34, 2  ;;  %v466_v40 = vrot.slane %v1102_v35, 4 }
 0x1ad   : > { %v464_v41 = vrot.slane %v463_v36, 1  ;;  %v456_v42 = vrot.slane %v455_v37, 2  ;;  %v478_v43 = vrot.slane %v1105_v38, 4 }
 0x1ae   : > { %v475_v44 = vadd.f32 %v474_v39, %v473_v34  ;;  %v467_v45 = vadd.f32 %v1102_v35, %v466_v40 }
 0x1af   : > { %v1110_v46 = vpop.eup %833  ;;  %v465_v47 = vadd.f32 %v464_v41, %v463_v36  ;;  %v457_v48 = vadd.f32 %v456_v42, %v455_v37  ;;  %v479_v49 = vadd.f32 %v1105_v38, %v478_v43 }
 0x1b0   : > { %v1113_v50 = vpop.eup %835  ;;  %v476_v51 = vrot.slane %v475_v44, 1  ;;  %v468_v52 = vrot.slane %v467_v45, 2  ;;  %v484_v53 = vrot.slane %v1110_v46, 4 }
 0x1b1   : > { %839 = vrcp.f32 %v465_v47  ;;  %v458_v54 = vrot.slane %v457_v48, 1  ;;  %v480_v55 = vrot.slane %v479_v49, 2  ;;  %v490_v56 = vrot.slane %v1113_v50, 4 }
 0x1b2   : > { %v477_v57 = vadd.f32 %v476_v51, %v475_v44  ;;  %v469_v58 = vadd.f32 %v468_v52, %v467_v45  ;;  %v485_v59 = vadd.f32 %v1110_v46, %v484_v53 }
 0x1b3   : > { %v1118_v60 = vpop.eup %837  ;;  %v459_v61 = vadd.f32 %v458_v54, %v457_v48  ;;  %v481_v62 = vadd.f32 %v480_v55, %v479_v49  ;;  %v491_v63 = vadd.f32 %v1113_v50, %v490_v56 }
 0x1b4   : > { %v470_v0 = vrot.slane %v469_v58, 1  ;;  %v486_v1 = vrot.slane %v485_v59, 2  ;;  %v496_v2 = vrot.slane %v1118_v60, 4  ;;  %841 = vrcp.f32 %v477_v57 }
 0x1b5   : > { %843 = vrcp.f32 %v459_v61  ;;  %v482_v3 = vrot.slane %v481_v62, 1  ;;  %v492_v4 = vrot.slane %v491_v63, 2 }
 0x1b6   : > { %v471_v5 = vadd.f32 %v470_v0, %v469_v58  ;;  %v497_v6 = vadd.f32 %v1118_v60, %v496_v2  ;;  %v487_v8 = vadd.f32 %v486_v1, %v485_v59 }
 0x1b7   : > { %v483_v7 = vadd.f32 %v482_v3, %v481_v62  ;;  %v493_v9 = vadd.f32 %v492_v4, %v491_v63 }
 0x1b8   : > { %845 = vrcp.f32 %v471_v5  ;;  %v488_v10 = vrot.slane %v487_v8, 1  ;;  %v498_v11 = vrot.slane %v497_v6, 2 }
 0x1b9   : > { %v494_v12 = vrot.slane %v493_v9, 1  ;;  %847 = vrcp.f32 %v483_v7 }
 0x1ba   : > { %v489_v15 = vadd.f32 %v488_v10, %v487_v8  ;;  %v499_v16 = vadd.f32 %v498_v11, %v497_v6 }
 0x1bb   : > { %v495_v25 = vadd.f32 %v494_v12, %v493_v9 }
 0x1bc   : > { %v500_v13 = vrot.slane %v499_v16, 1  ;;  %849 = vrcp.f32 %v489_v15 }
 0x1bd   : > { %851 = vrcp.f32 %v495_v25 }
 0x1be   : > { %v840_v24 = vpop.eup %839  ;;  %v501_v27 = vadd.f32 %v500_v13, %v499_v16 }
 0x1bf   : > { %v511_v29 = vmul.f32 %v840_v24, %v1091_v26 }
 0x1c0   : > { %853 = vrcp.f32 %v501_v27 }
 0x1c1   : > { %v842_v31 = vpop.eup %841  ;;  %v519_v32 = vmul.f32 %v511_v29, %v1050_v17 }
 0x1c2   : > { %v844_v33 = vpop.eup %843  ;;  %v513_v34 = vmul.f32 %v842_v31, %v1094_v28 }
 0x1c3   : > { %v510_v36 = vmul.f32 %v844_v33, %v1097_v30  ;;  %v532_v37 = vrot.slane %v519_v32, 4 }
 0x1c4   : > { %v521_v39 = vmul.f32 %v513_v34, %v1067_v22 }
 0x1c5   : > { %v846_v40 = vpop.eup %845  ;;  %v518_v41 = vmul.f32 %v510_v36, %v1040_v14  ;;  %v533_v42 = vadd.f32 %v532_v37, %v519_v32 }
 0x1c6   : > { %v848_v43 = vpop.eup %847  ;;  %v512_v44 = vmul.f32 %v846_v40, %v1102_v35  ;;  %v544_v26 = vrot.slane %v521_v39, 4 }
 0x1c7   : > { %v514_v45 = vmul.f32 %v848_v43, %v1105_v38  ;;  %v526_v47 = vrot.slane %v518_v41, 4  ;;  %v534_v17 = vrot.slane %v533_v42, 2 }
 0x1c8   : > { %v520_v48 = vmul.f32 %v512_v44, %v1053_v18  ;;  %v545_v28 = vadd.f32 %v544_v26, %v521_v39 }
 0x1c9   : > { %v850_v49 = vpop.eup %849  ;;  %v522_v30 = vmul.f32 %v514_v45, %v1056_v19  ;;  %v527_v51 = vadd.f32 %v526_v47, %v518_v41  ;;  %v535_v55 = vadd.f32 %v534_v17, %v533_v42 }
 0x1ca   : > { %v852_v22 = vpop.eup %851  ;;  %v515_v52 = vmul.f32 %v850_v49, %v1110_v46  ;;  %v538_v14 = vrot.slane %v520_v48, 4  ;;  %v546_v53 = vrot.slane %v545_v28, 2 }
 0x1cb   : > { %v516_v54 = vmul.f32 %v852_v22, %v1113_v50  ;;  %v528_v35 = vrot.slane %v527_v51, 2  ;;  %v550_v56 = vrot.slane %v522_v30, 4  ;;  %v536_v1 = vrot.slane %v535_v55, 1 }
 0x1cc   : > { %v523_v38 = vmul.f32 %v515_v52, %v1059_v20  ;;  %v539_v57 = vadd.f32 %v538_v14, %v520_v48  ;;  %v547_v19 = vadd.f32 %v546_v53, %v545_v28 }
 0x1cd   : > { %v854_v18 = vpop.eup %853  ;;  %v524_v58 = vmul.f32 %v516_v54, %v1063_v21  ;;  %v529_v59 = vadd.f32 %v528_v35, %v527_v51  ;;  %v551_v61 = vadd.f32 %v550_v56, %v522_v30 }
 0x1ce   : > { %v517_v62 = vmul.f32 %v854_v18, %v1118_v60  ;;  %v540_v46 = vrot.slane %v539_v57, 2  ;;  %v556_v63 = vrot.slane %v523_v38, 4  ;;  %v548_v6 = vrot.slane %v547_v19, 1 }
 0x1cf   : > { %v530_v0 = vrot.slane %v529_v59, 1  ;;  %v552_v50 = vrot.slane %v551_v61, 2  ;;  %v562_v2 = vrot.slane %v524_v58, 4  ;;  %v537_v60 = vadd.f32 %v536_v1, %v535_v55 }
 0x1d0   : > { %v525_v3 = vmul.f32 %v517_v62, %v1073_v23  ;;  %v541_v20 = vadd.f32 %v540_v46, %v539_v57  ;;  %v557_v4 = vadd.f32 %v556_v63, %v523_v38  ;;  %v549_v25 = vadd.f32 %v548_v6, %v547_v19 }
 0x1d1   : > { %v531_v5 = vadd.f32 %v530_v0, %v529_v59  ;;  %v553_v21 = vadd.f32 %v552_v50, %v551_v61  ;;  %v563_v8 = vadd.f32 %v562_v2, %v524_v58 }
 0x1d2   : > { %v542_v7 = vrot.slane %v541_v20, 1  ;;  %v558_v9 = vrot.slane %v557_v4, 2  ;;  %v568_v10 = vrot.slane %v525_v3, 4 }
 0x1d3   : > { %v554_v11 = vrot.slane %v553_v21, 1  ;;  %v564_v12 = vrot.slane %v563_v8, 2  ;;  %v583_v24 = vsel %vm582_vm1, %v537_v60, %v531_v5 }
 0x1d4   : > { %v543_v23 = vadd.f32 %v542_v7, %v541_v20  ;;  %v559_v15 = vadd.f32 %v558_v9, %v557_v4  ;;  %v569_v16 = vadd.f32 %v568_v10, %v525_v3 }
 0x1d5   : > { %v565_v13 = vadd.f32 %v564_v12, %v563_v8  ;;  %v555_v27 = vadd.f32 %v554_v11, %v553_v21 }
 0x1d6   : > { %v560_v29 = vrot.slane %v559_v15, 1  ;;  %v570_v31 = vrot.slane %v569_v16, 2  ;;  %v585_v32 = vsel %vm584_vm2, %v543_v23, %v583_v24 }
 0x1d7   : > { %v566_v33 = vrot.slane %v565_v13, 1  ;;  %v587_v34 = vsel %vm586_vm3, %v549_v25, %v585_v32 }
 0x1d8   : > { %v561_v36 = vadd.f32 %v560_v29, %v559_v15  ;;  %v571_v37 = vadd.f32 %v570_v31, %v569_v16  ;;  %v589_v39 = vsel %vm588_vm4, %v555_v27, %v587_v34 }
 0x1d9   : > { %v567_v40 = vadd.f32 %v566_v33, %v565_v13 }
 0x1da   : > { %v572_v41 = vrot.slane %v571_v37, 1  ;;  %v591_v42 = vsel %vm590_vm5, %v561_v36, %v589_v39 }
 0x1db   : > { %v593_v44 = vsel %vm592_vm6, %v567_v40, %v591_v42 }
 0x1dc   : > { %v573_v43 = vadd.f32 %v572_v41, %v571_v37 }
 0x1de   : > { %v595_v26 = vsel %vm594_vm7, %v573_v43, %v593_v44 }
 0x1df   : > { %597 = vst [vmem:[%s191_s12] sm:$0xff] %v595_v26 }
 0x1e0   : > { %868 = shalt.err (!%p865_p3)
}
 0x1e1   : > { %s869_s29 = scalar_lea.hbm %s1149_s11, 128  ;;  %s873_s6 = scalar_lea.hbm %s1190_s4, 256 }
 0x1e2   : > { %p870_p4 = scmp.ne.s32.totalorder %s1149_s11, %s869_s29  ;;  %p874_p9 = scmp.lt.s32.totalorder %s1149_s11, %s1190_s4 }
 0x1e3   : > { %p875_p10 = scmp.lt.s32.totalorder %s873_s6, %s869_s29 }
 0x1e4   : > { %p871_p7 = pnand %p870_p4, %p981_p5 }
 0x1e5   : > { %p876_p11 = por %p875_p10, %p874_p9 }
 0x1e6   : > { %p872_p8 = pneg %p871_p7 }
 0x1e8   : > { %p877_p12 = pnand %p876_p11, %p872_p8 }
 0x1ea   : > { %880 = shalt.err (!%p877_p12)
}
 0x1eb   : > { %784 = dma.vmem_to_hbm [thread:$0]  (%p981_p5), %s613_s13, 128, %s1149_s11, %s599_s22  }
 0x1ec PF: > { %p790_p13 = scmp.ge.s32.totalorder %s915_s18, 2  ;;  %s624_s9 = sand.u32 1, %s903_s15  }
 0x1ed   : > { %s625_s10 = scalar_lea.sflag [#allocation3], %s624_s9 }
 0x1ee   : > { %p787_p0 = pnand %p790_p13, %p985_p6 }
 0x1f0   : > { %p788_p1 = pneg %p787_p0 }
 0x1f2   : > { %898 = dma.done.wait (%p788_p1), %s625_s10, 128  }
 0x1f3   : > { %900 = vsyncadd (%p788_p1), %s625_s10, 4294967168  ;;  %p14_p2 = scmp.ge.s32.totalorder %s968_s21, 4   ;;  %s1193_s15 = smov %s907_s16 }
 0x1f4   : > { %s1194_s16 = smov %s911_s17  ;;  %s1195_s17 = smov %s979_s24 }
 0x1f5   : > { %s1196_s18 = smov %s968_s21  ;;  %16 = sbr.rel (!%p14_p2) target bundleno = 3 (0x3), region = 71 }
 0x1fa   :  { %630 = vsyncpa [#allocation3], 1 }
 0x1fb   :  { %632 = vsyncpa [#allocation3 + $0x1], 1 }

</bundles_post_ra>
